<compile_context>
chip_gen: v6e
topology: v6e:2x2x1
jax: 0.10.0
libtpu: 0.0.40
codegen_flags: <defaults>
</compile_context>

<pallas_src>
import functools

import jax
import jax.numpy as jnp
from jax import lax
from jax.experimental import pallas as pl
from jax.experimental.pallas import tpu as pltpu


def _dilated_block_kernel(dilation, T,
                          x_ref, step_ref, cond_ref,
                          wdx_ref, wds_ref, bd_ref,
                          wsc_ref, bsc_ref,
                          wgt_ref, bgt_ref,
                          wout_ref, bout_ref,
                          wnx_ref, bnx_ref,
                          next_ref, out_ref):
    f32 = jnp.float32
    x = x_ref[0].astype(f32)          # (C, T)
    cond = cond_ref[0].astype(f32)    # (C, T)
    step_row = step_ref[0].astype(f32)  # (1, C)

    # ---- "down" 1x1 conv on cat([x, step]) ---------------------------------
    # cat([x, step_bcast]) conv1x1  ==  W[:, :C] @ x  +  (W[:, C:] @ step + b)
    # step is time-invariant, so its contribution is a per-channel bias.
    step_bias = jnp.sum(wds_ref[...] * step_row, axis=1, keepdims=True) + bd_ref[...]  # (C, 1)
    y = jnp.dot(wdx_ref[...], x, preferred_element_type=f32) + step_bias + cond        # (C, T)

    # ---- zero-padded +/- dilation shifts along time (lane axis) ------------
    d = dilation
    lane = lax.broadcasted_iota(jnp.int32, y.shape, 1)
    y_m = jnp.where(lane >= d, pltpu.roll(y, d, axis=1), 0.0)                # y[t - d]
    y_p = jnp.where(lane < T - d, pltpu.roll(y, (T - d) % T, axis=1), 0.0)   # y[t + d]

    def dilated_conv(w_ref, b_ref):
        return (jnp.dot(w_ref[0], y_m, preferred_element_type=f32)
                + jnp.dot(w_ref[1], y, preferred_element_type=f32)
                + jnp.dot(w_ref[2], y_p, preferred_element_type=f32)
                + b_ref[...])

    scale = dilated_conv(wsc_ref, bsc_ref)
    gate = dilated_conv(wgt_ref, bgt_ref)

    # ---- gated activation, fused in-kernel (EUP tanh/exp) ------------------
    z = jnp.tanh(scale) * (1.0 / (1.0 + jnp.exp(-gate)))

    out = jnp.dot(wout_ref[...], z, preferred_element_type=f32) + bout_ref[...]
    nxt = jnp.dot(wnx_ref[...], z, preferred_element_type=f32) + bnx_ref[...] + x

    out_ref[0] = out.astype(out_ref.dtype)
    next_ref[0] = nxt.astype(next_ref.dtype)


def dilated_block_forward(x, step, cond, params, dilation):
    """Pallas forward of DilatedBlock. x, cond: (B, C, T); step: (B, C)."""
    B, C, T = x.shape

    # PyTorch Conv1d weight layout is (out, in, k).
    wdx = params["w_down"][:, :C, 0]          # (C, C)  acts on x
    wds = params["w_down"][:, C:, 0]          # (C, C)  acts on broadcast step
    wsc = jnp.transpose(params["w_scale"], (2, 0, 1))   # (3, C, C)
    wgt = jnp.transpose(params["w_gate"], (2, 0, 1))    # (3, C, C)
    wout = params["w_out"][:, :, 0]           # (C, C)
    wnx = params["w_next"][:, :, 0]           # (C, C)

    col = lambda b: b.reshape(C, 1)           # per-channel bias as (C, 1)
    step3 = step.reshape(B, 1, C)             # kernel reads (1, C) row

    per_batch = pl.BlockSpec((1, C, T), lambda b: (b, 0, 0))
    step_spec = pl.BlockSpec((1, 1, C), lambda b: (b, 0, 0))

    def full_spec(a):
        return pl.BlockSpec(a.shape, lambda b: (0,) * a.ndim)

    kernel = functools.partial(_dilated_block_kernel, int(dilation), int(T))

    itemsize = 4
    flops = B * (9 * 2 * C * C * T + 2 * C * C + 10 * C * T)
    transcendentals = 3 * B * C * T
    bytes_accessed = itemsize * (4 * B * C * T + B * C + 10 * C * C + 5 * C)

    args = (x, step3, cond,
            wdx, wds, col(params["b_down"]),
            wsc, col(params["b_scale"]),
            wgt, col(params["b_gate"]),
            wout, col(params["b_out"]),
            wnx, col(params["b_next"]))

    in_specs = [per_batch, step_spec, per_batch] + [full_spec(a) for a in args[3:]]

    nxt, out = pl.pallas_call(
        kernel,
        out_shape=(jax.ShapeDtypeStruct((B, C, T), x.dtype),
                   jax.ShapeDtypeStruct((B, C, T), x.dtype)),
        grid_spec=pltpu.PrefetchScalarGridSpec(
            num_scalar_prefetch=0,
            grid=(B,),
            in_specs=in_specs,
            out_specs=(per_batch, per_batch),
        ),
        compiler_params=pltpu.CompilerParams(
            dimension_semantics=("parallel",)),
        cost_estimate=pl.CostEstimate(
            flops=flops,
            transcendentals=transcendentals,
            bytes_accessed=bytes_accessed),
    )(*args)
    return nxt, out


# ----------------------------- reference (XLA) -------------------------------
def _conv1d(x, w, b, dilation=1, padding=0):
    # x: (B, Cin, T), w: (Cout, Cin, K) in PyTorch layout.
    out = lax.conv_general_dilated(
        x, w, window_strides=(1,), padding=[(padding, padding)],
        rhs_dilation=(dilation,), dimension_numbers=("NCH", "OIH", "NCH"))
    return out + b[None, :, None]


def reference_dilated_block(x, step, cond, params, dilation):
    B, C, T = x.shape
    skip = x
    step_b = jnp.broadcast_to(step[:, :, None], (B, C, T))
    xc = jnp.concatenate([x, step_b], axis=1)
    y = _conv1d(xc, params["w_down"], params["b_down"])
    y = y + cond
    scale = _conv1d(y, params["w_scale"], params["b_scale"], dilation, dilation)
    gate = _conv1d(y, params["w_gate"], params["b_gate"], dilation, dilation)
    z = jnp.tanh(scale) * jax.nn.sigmoid(gate)
    out = _conv1d(z, params["w_out"], params["b_out"])
    nxt = _conv1d(z, params["w_next"], params["b_next"]) + skip
    return nxt, out


if __name__ == "__main__":
    B, C, T, dilation = 2, 16, 128, 3

    key = jax.random.PRNGKey(0)
    ks = jax.random.split(key, 13)

    def init(k, shape, fan_in):
        return jax.random.normal(k, shape, dtype=jnp.float32) / jnp.sqrt(float(fan_in))

    params = {
        "w_down": init(ks[0], (C, 2 * C, 1), 2 * C), "b_down": init(ks[1], (C,), 2 * C),
        "w_scale": init(ks[2], (C, C, 3), 3 * C),    "b_scale": init(ks[3], (C,), 3 * C),
        "w_gate": init(ks[4], (C, C, 3), 3 * C),     "b_gate": init(ks[5], (C,), 3 * C),
        "w_out": init(ks[6], (C, C, 1), C),          "b_out": init(ks[7], (C,), C),
        "w_next": init(ks[8], (C, C, 1), C),         "b_next": init(ks[9], (C,), C),
    }
    x = jax.random.normal(ks[10], (B, C, T), dtype=jnp.float32)
    step = jax.random.normal(ks[11], (B, C), dtype=jnp.float32)
    cond = jax.random.normal(ks[12], (B, C, T), dtype=jnp.float32)

    nxt, out = dilated_block_forward(x, step, cond, params, dilation)
    nxt = jax.block_until_ready(nxt)
    out = jax.block_until_ready(out)

    ref_nxt, ref_out = reference_dilated_block(x, step, cond, params, dilation)

    assert nxt.shape == (B, C, T) and out.shape == (B, C, T)
    assert nxt.dtype == x.dtype and out.dtype == x.dtype
    assert jnp.allclose(nxt, ref_nxt, atol=1e-3, rtol=1e-3), "next mismatch vs reference"
    assert jnp.allclose(out, ref_out, atol=1e-3, rtol=1e-3), "out mismatch vs reference"

    print("KERNEL_OK")
</pallas_src>

<mosaic_0001>
module attributes {stable_mosaic.version = 11 : i64} {
  func.func @_dilated_block_kernel(%arg0: i32, %arg1: memref<1x16x128xf32, #tpu.memory_space<vmem>>, %arg2: memref<1x1x16xf32, #tpu.memory_space<vmem>>, %arg3: memref<1x16x128xf32, #tpu.memory_space<vmem>>, %arg4: memref<16x16xf32, #tpu.memory_space<vmem>>, %arg5: memref<16x16xf32, #tpu.memory_space<vmem>>, %arg6: memref<16x1xf32, #tpu.memory_space<vmem>>, %arg7: memref<3x16x16xf32, #tpu.memory_space<vmem>>, %arg8: memref<16x1xf32, #tpu.memory_space<vmem>>, %arg9: memref<3x16x16xf32, #tpu.memory_space<vmem>>, %arg10: memref<16x1xf32, #tpu.memory_space<vmem>>, %arg11: memref<16x16xf32, #tpu.memory_space<vmem>>, %arg12: memref<16x1xf32, #tpu.memory_space<vmem>>, %arg13: memref<16x16xf32, #tpu.memory_space<vmem>>, %arg14: memref<16x1xf32, #tpu.memory_space<vmem>>, %arg15: memref<1x16x128xf32, #tpu.memory_space<vmem>>, %arg16: memref<1x16x128xf32, #tpu.memory_space<vmem>>) attributes {dimension_semantics = [#tpu.dimension_semantics<parallel>], iteration_bounds = array<i64: 2>, scalar_prefetch = 0 : i64, scratch_operands = 0 : i64, tpu.core_type = #tpu.core_type<tc>, window_params = [{transform_indices = @transform_0, window_bounds = array<i64: 1, 16, 128>}, {transform_indices = @transform_1, window_bounds = array<i64: 1, 1, 16>}, {transform_indices = @transform_2, window_bounds = array<i64: 1, 16, 128>}, {pipeline_mode = #tpu.pipeline_mode<synchronous>, transform_indices = @transform_3, window_bounds = array<i64: 16, 16>}, {pipeline_mode = #tpu.pipeline_mode<synchronous>, transform_indices = @transform_4, window_bounds = array<i64: 16, 16>}, {pipeline_mode = #tpu.pipeline_mode<synchronous>, transform_indices = @transform_5, window_bounds = array<i64: 16, 1>}, {pipeline_mode = #tpu.pipeline_mode<synchronous>, transform_indices = @transform_6, window_bounds = array<i64: 3, 16, 16>}, {pipeline_mode = #tpu.pipeline_mode<synchronous>, transform_indices = @transform_7, window_bounds = array<i64: 16, 1>}, {pipeline_mode = #tpu.pipeline_mode<synchronous>, transform_indices = @transform_8, window_bounds = array<i64: 3, 16, 16>}, {pipeline_mode = #tpu.pipeline_mode<synchronous>, transform_indices = @transform_9, window_bounds = array<i64: 16, 1>}, {pipeline_mode = #tpu.pipeline_mode<synchronous>, transform_indices = @transform_10, window_bounds = array<i64: 16, 16>}, {pipeline_mode = #tpu.pipeline_mode<synchronous>, transform_indices = @transform_11, window_bounds = array<i64: 16, 1>}, {pipeline_mode = #tpu.pipeline_mode<synchronous>, transform_indices = @transform_12, window_bounds = array<i64: 16, 16>}, {pipeline_mode = #tpu.pipeline_mode<synchronous>, transform_indices = @transform_13, window_bounds = array<i64: 16, 1>}, {transform_indices = @transform_14, window_bounds = array<i64: 1, 16, 128>}, {transform_indices = @transform_15, window_bounds = array<i64: 1, 16, 128>}]} {
    %c0 = arith.constant 0 : index
    %c0_0 = arith.constant 0 : index
    %c0_1 = arith.constant 0 : index
    %0 = vector.load %arg1[%c0, %c0_0, %c0_1] : memref<1x16x128xf32, #tpu.memory_space<vmem>>, vector<1x16x128xf32>
    %1 = vector.shape_cast %0 : vector<1x16x128xf32> to vector<16x128xf32>
    %c0_2 = arith.constant 0 : index
    %c0_3 = arith.constant 0 : index
    %c0_4 = arith.constant 0 : index
    %2 = vector.load %arg3[%c0_2, %c0_3, %c0_4] : memref<1x16x128xf32, #tpu.memory_space<vmem>>, vector<1x16x128xf32>
    %3 = vector.shape_cast %2 : vector<1x16x128xf32> to vector<16x128xf32>
    %c0_5 = arith.constant 0 : index
    %c0_6 = arith.constant 0 : index
    %c0_7 = arith.constant 0 : index
    %4 = vector.load %arg2[%c0_5, %c0_6, %c0_7] : memref<1x1x16xf32, #tpu.memory_space<vmem>>, vector<1x1x16xf32>
    %5 = vector.shape_cast %4 : vector<1x1x16xf32> to vector<1x16xf32>
    %c0_8 = arith.constant 0 : index
    %c0_9 = arith.constant 0 : index
    %6 = vector.load %arg5[%c0_8, %c0_9] : memref<16x16xf32, #tpu.memory_space<vmem>>, vector<16x16xf32>
    %7 = vector.broadcast %5 : vector<1x16xf32> to vector<16x16xf32>
    %8 = arith.mulf %6, %7 : vector<16x16xf32>
    %cst = arith.constant dense<0.000000e+00> : vector<16xf32>
    %9 = vector.multi_reduction <add>, %8, %cst [1] : vector<16x16xf32> to vector<16xf32>
    %10 = vector.shape_cast %9 : vector<16xf32> to vector<16x1xf32>
    %c0_10 = arith.constant 0 : index
    %c0_11 = arith.constant 0 : index
    %11 = vector.load %arg6[%c0_10, %c0_11] : memref<16x1xf32, #tpu.memory_space<vmem>>, vector<16x1xf32>
    %12 = arith.addf %10, %11 : vector<16x1xf32>
    %c0_12 = arith.constant 0 : index
    %c0_13 = arith.constant 0 : index
    %13 = vector.load %arg4[%c0_12, %c0_13] : memref<16x16xf32, #tpu.memory_space<vmem>>, vector<16x16xf32>
    %cst_14 = arith.constant dense<0.000000e+00> : vector<16x128xf32>
    %14 = tpu.matmul %13, %1, %cst_14 {dimension_numbers = #tpu.dot_dimension_numbers<[1], [0], [0], [1], [0, 0, 1, 1], [], []>} : vector<16x16xf32>, vector<16x128xf32>, vector<16x128xf32> -> vector<16x128xf32>
    %15 = vector.broadcast %12 : vector<16x1xf32> to vector<16x128xf32>
    %16 = arith.addf %14, %15 : vector<16x128xf32>
    %17 = arith.addf %16, %3 : vector<16x128xf32>
    %18 = tpu.iota {dimensions = array<i32: 1>} : vector<16x128xi32>
    %c3_i32 = arith.constant 3 : i32
    %19 = vector.broadcast %c3_i32 : i32 to vector<16x128xi32>
    %20 = arith.cmpi sge, %18, %19 : vector<16x128xi32>
    %c3_i32_15 = arith.constant 3 : i32
    %21 = tpu.dynamic_rotate %17 by %c3_i32_15 dim 1 : vector<16x128xf32>, i32 -> vector<16x128xf32>
    %cst_16 = arith.constant 0.000000e+00 : f32
    %22 = vector.broadcast %cst_16 : f32 to vector<16x128xf32>
    %23 = arith.select %20, %21, %22 : vector<16x128xi1>, vector<16x128xf32>
    %c125_i32 = arith.constant 125 : i32
    %24 = vector.broadcast %c125_i32 : i32 to vector<16x128xi32>
    %25 = arith.cmpi slt, %18, %24 : vector<16x128xi32>
    %c125_i32_17 = arith.constant 125 : i32
    %26 = tpu.dynamic_rotate %17 by %c125_i32_17 dim 1 : vector<16x128xf32>, i32 -> vector<16x128xf32>
    %cst_18 = arith.constant 0.000000e+00 : f32
    %27 = vector.broadcast %cst_18 : f32 to vector<16x128xf32>
    %28 = arith.select %25, %26, %27 : vector<16x128xi1>, vector<16x128xf32>
    %c0_19 = arith.constant 0 : index
    %c0_20 = arith.constant 0 : index
    %c0_21 = arith.constant 0 : index
    %29 = vector.load %arg7[%c0_19, %c0_20, %c0_21] : memref<3x16x16xf32, #tpu.memory_space<vmem>>, vector<1x16x16xf32>
    %30 = vector.shape_cast %29 : vector<1x16x16xf32> to vector<16x16xf32>
    %cst_22 = arith.constant dense<0.000000e+00> : vector<16x128xf32>
    %31 = tpu.matmul %30, %23, %cst_22 {dimension_numbers = #tpu.dot_dimension_numbers<[1], [0], [0], [1], [0, 0, 1, 1], [], []>} : vector<16x16xf32>, vector<16x128xf32>, vector<16x128xf32> -> vector<16x128xf32>
    %c1 = arith.constant 1 : index
    %c0_23 = arith.constant 0 : index
    %c0_24 = arith.constant 0 : index
    %32 = vector.load %arg7[%c1, %c0_23, %c0_24] : memref<3x16x16xf32, #tpu.memory_space<vmem>>, vector<1x16x16xf32>
    %33 = vector.shape_cast %32 : vector<1x16x16xf32> to vector<16x16xf32>
    %cst_25 = arith.constant dense<0.000000e+00> : vector<16x128xf32>
    %34 = tpu.matmul %33, %17, %cst_25 {dimension_numbers = #tpu.dot_dimension_numbers<[1], [0], [0], [1], [0, 0, 1, 1], [], []>} : vector<16x16xf32>, vector<16x128xf32>, vector<16x128xf32> -> vector<16x128xf32>
    %35 = arith.addf %31, %34 : vector<16x128xf32>
    %c2 = arith.constant 2 : index
    %c0_26 = arith.constant 0 : index
    %c0_27 = arith.constant 0 : index
    %36 = vector.load %arg7[%c2, %c0_26, %c0_27] : memref<3x16x16xf32, #tpu.memory_space<vmem>>, vector<1x16x16xf32>
    %37 = vector.shape_cast %36 : vector<1x16x16xf32> to vector<16x16xf32>
    %cst_28 = arith.constant dense<0.000000e+00> : vector<16x128xf32>
    %38 = tpu.matmul %37, %28, %cst_28 {dimension_numbers = #tpu.dot_dimension_numbers<[1], [0], [0], [1], [0, 0, 1, 1], [], []>} : vector<16x16xf32>, vector<16x128xf32>, vector<16x128xf32> -> vector<16x128xf32>
    %39 = arith.addf %35, %38 : vector<16x128xf32>
    %c0_29 = arith.constant 0 : index
    %c0_30 = arith.constant 0 : index
    %40 = vector.load %arg8[%c0_29, %c0_30] : memref<16x1xf32, #tpu.memory_space<vmem>>, vector<16x1xf32>
    %41 = vector.broadcast %40 : vector<16x1xf32> to vector<16x128xf32>
    %42 = arith.addf %39, %41 : vector<16x128xf32>
    %c0_31 = arith.constant 0 : index
    %c0_32 = arith.constant 0 : index
    %c0_33 = arith.constant 0 : index
    %43 = vector.load %arg9[%c0_31, %c0_32, %c0_33] : memref<3x16x16xf32, #tpu.memory_space<vmem>>, vector<1x16x16xf32>
    %44 = vector.shape_cast %43 : vector<1x16x16xf32> to vector<16x16xf32>
    %cst_34 = arith.constant dense<0.000000e+00> : vector<16x128xf32>
    %45 = tpu.matmul %44, %23, %cst_34 {dimension_numbers = #tpu.dot_dimension_numbers<[1], [0], [0], [1], [0, 0, 1, 1], [], []>} : vector<16x16xf32>, vector<16x128xf32>, vector<16x128xf32> -> vector<16x128xf32>
    %c1_35 = arith.constant 1 : index
    %c0_36 = arith.constant 0 : index
    %c0_37 = arith.constant 0 : index
    %46 = vector.load %arg9[%c1_35, %c0_36, %c0_37] : memref<3x16x16xf32, #tpu.memory_space<vmem>>, vector<1x16x16xf32>
    %47 = vector.shape_cast %46 : vector<1x16x16xf32> to vector<16x16xf32>
    %cst_38 = arith.constant dense<0.000000e+00> : vector<16x128xf32>
    %48 = tpu.matmul %47, %17, %cst_38 {dimension_numbers = #tpu.dot_dimension_numbers<[1], [0], [0], [1], [0, 0, 1, 1], [], []>} : vector<16x16xf32>, vector<16x128xf32>, vector<16x128xf32> -> vector<16x128xf32>
    %49 = arith.addf %45, %48 : vector<16x128xf32>
    %c2_39 = arith.constant 2 : index
    %c0_40 = arith.constant 0 : index
    %c0_41 = arith.constant 0 : index
    %50 = vector.load %arg9[%c2_39, %c0_40, %c0_41] : memref<3x16x16xf32, #tpu.memory_space<vmem>>, vector<1x16x16xf32>
    %51 = vector.shape_cast %50 : vector<1x16x16xf32> to vector<16x16xf32>
    %cst_42 = arith.constant dense<0.000000e+00> : vector<16x128xf32>
    %52 = tpu.matmul %51, %28, %cst_42 {dimension_numbers = #tpu.dot_dimension_numbers<[1], [0], [0], [1], [0, 0, 1, 1], [], []>} : vector<16x16xf32>, vector<16x128xf32>, vector<16x128xf32> -> vector<16x128xf32>
    %53 = arith.addf %49, %52 : vector<16x128xf32>
    %c0_43 = arith.constant 0 : index
    %c0_44 = arith.constant 0 : index
    %54 = vector.load %arg10[%c0_43, %c0_44] : memref<16x1xf32, #tpu.memory_space<vmem>>, vector<16x1xf32>
    %55 = vector.broadcast %54 : vector<16x1xf32> to vector<16x128xf32>
    %56 = arith.addf %53, %55 : vector<16x128xf32>
    %57 = math.tanh %42 : vector<16x128xf32>
    %cst_45 = arith.constant 0.000000e+00 : f32
    %58 = vector.broadcast %cst_45 : f32 to vector<16x128xf32>
    %59 = arith.subf %58, %56 : vector<16x128xf32>
    %60 = math.exp %59 : vector<16x128xf32>
    %cst_46 = arith.constant 1.000000e+00 : f32
    %61 = vector.broadcast %cst_46 : f32 to vector<16x128xf32>
    %62 = arith.addf %61, %60 : vector<16x128xf32>
    %cst_47 = arith.constant 1.000000e+00 : f32
    %63 = vector.broadcast %cst_47 : f32 to vector<16x128xf32>
    %64 = arith.divf %63, %62 : vector<16x128xf32>
    %65 = arith.mulf %57, %64 : vector<16x128xf32>
    %c0_48 = arith.constant 0 : index
    %c0_49 = arith.constant 0 : index
    %66 = vector.load %arg11[%c0_48, %c0_49] : memref<16x16xf32, #tpu.memory_space<vmem>>, vector<16x16xf32>
    %cst_50 = arith.constant dense<0.000000e+00> : vector<16x128xf32>
    %67 = tpu.matmul %66, %65, %cst_50 {dimension_numbers = #tpu.dot_dimension_numbers<[1], [0], [0], [1], [0, 0, 1, 1], [], []>} : vector<16x16xf32>, vector<16x128xf32>, vector<16x128xf32> -> vector<16x128xf32>
    %c0_51 = arith.constant 0 : index
    %c0_52 = arith.constant 0 : index
    %68 = vector.load %arg12[%c0_51, %c0_52] : memref<16x1xf32, #tpu.memory_space<vmem>>, vector<16x1xf32>
    %69 = vector.broadcast %68 : vector<16x1xf32> to vector<16x128xf32>
    %70 = arith.addf %67, %69 : vector<16x128xf32>
    %c0_53 = arith.constant 0 : index
    %c0_54 = arith.constant 0 : index
    %71 = vector.load %arg13[%c0_53, %c0_54] : memref<16x16xf32, #tpu.memory_space<vmem>>, vector<16x16xf32>
    %cst_55 = arith.constant dense<0.000000e+00> : vector<16x128xf32>
    %72 = tpu.matmul %71, %65, %cst_55 {dimension_numbers = #tpu.dot_dimension_numbers<[1], [0], [0], [1], [0, 0, 1, 1], [], []>} : vector<16x16xf32>, vector<16x128xf32>, vector<16x128xf32> -> vector<16x128xf32>
    %c0_56 = arith.constant 0 : index
    %c0_57 = arith.constant 0 : index
    %73 = vector.load %arg14[%c0_56, %c0_57] : memref<16x1xf32, #tpu.memory_space<vmem>>, vector<16x1xf32>
    %74 = vector.broadcast %73 : vector<16x1xf32> to vector<16x128xf32>
    %75 = arith.addf %72, %74 : vector<16x128xf32>
    %76 = arith.addf %75, %1 : vector<16x128xf32>
    %c0_58 = arith.constant 0 : index
    %c0_59 = arith.constant 0 : index
    %c0_60 = arith.constant 0 : index
    %77 = vector.load %arg16[%c0_58, %c0_59, %c0_60] : memref<1x16x128xf32, #tpu.memory_space<vmem>>, vector<1x16x128xf32>
    %78 = vector.shape_cast %77 : vector<1x16x128xf32> to vector<16x128xf32>
    %79 = vector.shape_cast %70 : vector<16x128xf32> to vector<1x16x128xf32>
    tpu.vector_store %arg16[%c0_58, %c0_59, %c0_60], %79 {strides = array<i32>} : memref<1x16x128xf32, #tpu.memory_space<vmem>>, vector<1x16x128xf32>,
    %c0_61 = arith.constant 0 : index
    %c0_62 = arith.constant 0 : index
    %c0_63 = arith.constant 0 : index
    %80 = vector.load %arg15[%c0_61, %c0_62, %c0_63] : memref<1x16x128xf32, #tpu.memory_space<vmem>>, vector<1x16x128xf32>
    %81 = vector.shape_cast %80 : vector<1x16x128xf32> to vector<16x128xf32>
    %82 = vector.shape_cast %76 : vector<16x128xf32> to vector<1x16x128xf32>
    tpu.vector_store %arg15[%c0_61, %c0_62, %c0_63], %82 {strides = array<i32>} : memref<1x16x128xf32, #tpu.memory_space<vmem>>, vector<1x16x128xf32>,
    return
  }
  func.func @transform_0(%arg0: i32) -> (i32, i32, i32) {
    %c0_i32 = arith.constant 0 : i32
    %c0_i32_0 = arith.constant 0 : i32
    %c0_i32_1 = arith.constant 0 : i32
    return %arg0, %c0_i32, %c0_i32_0 : i32, i32, i32
  }
  func.func @transform_1(%arg0: i32) -> (i32, i32, i32) {
    %c0_i32 = arith.constant 0 : i32
    %c0_i32_0 = arith.constant 0 : i32
    %c0_i32_1 = arith.constant 0 : i32
    return %arg0, %c0_i32, %c0_i32_0 : i32, i32, i32
  }
  func.func @transform_2(%arg0: i32) -> (i32, i32, i32) {
    %c0_i32 = arith.constant 0 : i32
    %c0_i32_0 = arith.constant 0 : i32
    %c0_i32_1 = arith.constant 0 : i32
    return %arg0, %c0_i32, %c0_i32_0 : i32, i32, i32
  }
  func.func @transform_3(%arg0: i32) -> (i32, i32) {
    %c0_i32 = arith.constant 0 : i32
    %c0_i32_0 = arith.constant 0 : i32
    %c0_i32_1 = arith.constant 0 : i32
    return %c0_i32, %c0_i32_0 : i32, i32
  }
  func.func @transform_4(%arg0: i32) -> (i32, i32) {
    %c0_i32 = arith.constant 0 : i32
    %c0_i32_0 = arith.constant 0 : i32
    %c0_i32_1 = arith.constant 0 : i32
    return %c0_i32, %c0_i32_0 : i32, i32
  }
  func.func @transform_5(%arg0: i32) -> (i32, i32) {
    %c0_i32 = arith.constant 0 : i32
    %c0_i32_0 = arith.constant 0 : i32
    %c0_i32_1 = arith.constant 0 : i32
    return %c0_i32, %c0_i32_0 : i32, i32
  }
  func.func @transform_6(%arg0: i32) -> (i32, i32, i32) {
    %c0_i32 = arith.constant 0 : i32
    %c0_i32_0 = arith.constant 0 : i32
    %c0_i32_1 = arith.constant 0 : i32
    %c0_i32_2 = arith.constant 0 : i32
    return %c0_i32, %c0_i32_0, %c0_i32_1 : i32, i32, i32
  }
  func.func @transform_7(%arg0: i32) -> (i32, i32) {
    %c0_i32 = arith.constant 0 : i32
    %c0_i32_0 = arith.constant 0 : i32
    %c0_i32_1 = arith.constant 0 : i32
    return %c0_i32, %c0_i32_0 : i32, i32
  }
  func.func @transform_8(%arg0: i32) -> (i32, i32, i32) {
    %c0_i32 = arith.constant 0 : i32
    %c0_i32_0 = arith.constant 0 : i32
    %c0_i32_1 = arith.constant 0 : i32
    %c0_i32_2 = arith.constant 0 : i32
    return %c0_i32, %c0_i32_0, %c0_i32_1 : i32, i32, i32
  }
  func.func @transform_9(%arg0: i32) -> (i32, i32) {
    %c0_i32 = arith.constant 0 : i32
    %c0_i32_0 = arith.constant 0 : i32
    %c0_i32_1 = arith.constant 0 : i32
    return %c0_i32, %c0_i32_0 : i32, i32
  }
  func.func @transform_10(%arg0: i32) -> (i32, i32) {
    %c0_i32 = arith.constant 0 : i32
    %c0_i32_0 = arith.constant 0 : i32
    %c0_i32_1 = arith.constant 0 : i32
    return %c0_i32, %c0_i32_0 : i32, i32
  }
  func.func @transform_11(%arg0: i32) -> (i32, i32) {
    %c0_i32 = arith.constant 0 : i32
    %c0_i32_0 = arith.constant 0 : i32
    %c0_i32_1 = arith.constant 0 : i32
    return %c0_i32, %c0_i32_0 : i32, i32
  }
  func.func @transform_12(%arg0: i32) -> (i32, i32) {
    %c0_i32 = arith.constant 0 : i32
    %c0_i32_0 = arith.constant 0 : i32
    %c0_i32_1 = arith.constant 0 : i32
    return %c0_i32, %c0_i32_0 : i32, i32
  }
  func.func @transform_13(%arg0: i32) -> (i32, i32) {
    %c0_i32 = arith.constant 0 : i32
    %c0_i32_0 = arith.constant 0 : i32
    %c0_i32_1 = arith.constant 0 : i32
    return %c0_i32, %c0_i32_0 : i32, i32
  }
  func.func @transform_14(%arg0: i32) -> (i32, i32, i32) {
    %c0_i32 = arith.constant 0 : i32
    %c0_i32_0 = arith.constant 0 : i32
    %c0_i32_1 = arith.constant 0 : i32
    return %arg0, %c0_i32, %c0_i32_0 : i32, i32, i32
  }
  func.func @transform_15(%arg0: i32) -> (i32, i32, i32) {
    %c0_i32 = arith.constant 0 : i32
    %c0_i32_0 = arith.constant 0 : i32
    %c0_i32_1 = arith.constant 0 : i32
    return %arg0, %c0_i32, %c0_i32_0 : i32, i32, i32
  }
}

</mosaic_0001>

<bundles_post_ra>
// kernel: tpu_custom_call.1
= control target key start
LH: loop header
LB: loop body
LE: loop exit
PB: predicated region body
PF: predicated region fallthrough
CT: control target
= control target key end

     0   :  { %s2891_s0 = inlined_call_operand.hbm [shape: f32[2,16,128], index: 0, kind: input, shape index: {}]   ;;  %s2892_s1 = inlined_call_operand.hbm [shape: f32[2,1,16], index: 1, kind: input, shape index: {}]   ;;  %s2893_s2 = inlined_call_operand.hbm [shape: f32[2,16,128], index: 2, kind: input, shape index: {}]   ;;  %s2894_s3 = inlined_call_operand.hbm [shape: f32[16,16], index: 3, kind: input, shape index: {}]   ;;  %s2895_s4 = inlined_call_operand.hbm [shape: f32[16,16], index: 4, kind: input, shape index: {}]   ;;  %s2896_s5 = inlined_call_operand.vmem [shape: f32[16,1], index: 5, kind: input, shape index: {}]   ;;  %s2897_s6 = inlined_call_operand.vmem [shape: f32[3,16,16], index: 6, kind: input, shape index: {}]   ;;  %s2898_s7 = inlined_call_operand.vmem [shape: f32[16,1], index: 7, kind: input, shape index: {}]   ;;  %s2899_s8 = inlined_call_operand.vmem [shape: f32[3,16,16], index: 8, kind: input, shape index: {}]   ;;  %s2900_s9 = inlined_call_operand.vmem [shape: f32[16,1], index: 9, kind: input, shape index: {}]   ;;  %s2901_s10 = inlined_call_operand.hbm [shape: f32[16,16], index: 10, kind: input, shape index: {}]   ;;  %s2902_s11 = inlined_call_operand.vmem [shape: f32[16,1], index: 11, kind: input, shape index: {}]   ;;  %s2903_s12 = inlined_call_operand.hbm [shape: f32[16,16], index: 12, kind: input, shape index: {}]   ;;  %s2904_s13 = inlined_call_operand.vmem [shape: f32[16,1], index: 13, kind: input, shape index: {}]   ;;  %s2905_s14 = inlined_call_operand.hbm [shape: f32[2,16,128], index: 14, kind: output, shape index: {0}]   ;;  %s2906_s15 = inlined_call_operand.hbm [shape: f32[2,16,128], index: 15, kind: output, shape index: {1}]  }
   0x1   :  { %2931 = sst [smem:[#allocation30_spill]] %s2892_s1 }
   0x2   :  { %2932 = sst [smem:[#allocation31_spill]] %s2894_s3 }
   0x3   :  { %2933 = sst [smem:[#allocation32_spill]] %s2895_s4 }
   0x4   :  { %2934 = sst [smem:[#allocation33_spill]] %s2899_s8 }
   0x5   :  { %2935 = sst [smem:[#allocation34_spill]] %s2901_s10 }
   0x6   :  { %2936 = sst [smem:[#allocation35_spill]] %s2902_s11 }
   0x7   :  { %2937 = sst [smem:[#allocation36_spill]] %s2903_s12 }
   0x8   :  { %2938 = sst [smem:[#allocation37_spill]] %s2904_s13 }
   0x9   :  { %2939 = sst [smem:[#allocation38_spill]] %s2905_s14 }
   0xa   :  { %2940 = sst [smem:[#allocation39_spill]] %s2906_s15 }
   0xb   :  { %21 = vsyncpa [#allocation3], 0 }
   0xc   :  { %23 = vsyncpa [#allocation3 + $0x1], 0 }
   0xd   :  { %24 = vsyncpa [#allocation6], 0 }
   0xe   :  { %26 = vsyncpa [#allocation6 + $0x1], 0 }
   0xf   :  { %27 = vsyncpa [#allocation9], 0 }
  0x10   :  { %28 = vsyncpa [#allocation12], 0 }
  0x11   :  { %29 = vsyncpa [#allocation4], 0 }
  0x12   :  { %31 = vsyncpa [#allocation4 + $0x1], 0 }
  0x13   :  { %32 = vsyncpa [#allocation16], 0 }
  0x14   :  { %34 = vsyncpa [#allocation16 + $0x1], 0  ;;  %s2438_s18 = smov 0   ;;  %s2440_s19 = smov 0  }
  0x15   :  { %s2442_s20 = smov 0   ;;  %s2444_s21 = smov 0  }
  0x16 LB: > { %2941 = sst [smem:[#allocation23_spill]] %s2328_s18  ;;  %s2342_s22 = smov [#allocation8]   ;;  %s2340_s21 = sphi %s2444_s21, %s2985_s21   ;;  %s2336_s20 = sphi %s2442_s20, %s2987_s20   ;;  %s2332_s19 = sphi %s2440_s19, %s2989_s19   ;;  %s2328_s18 = sphi %s2438_s18, %s2988_s18  }
  0x17   : > { %2942 = sst [smem:[#allocation24_spill]] %s2336_s20  ;;  %s418_s23 = sshll.u32 %s2342_s22, 4  ;;  %s419_s23 = int_to_ptr.vmem [resolvable:$true] %s418_s23 }
  0x18   : > { %2943 = sst [smem:[#allocation25_spill]] %s2340_s21  ;;  %s2459_s24 = sadd.s32 4294967295, %s2340_s21  }
  0x19   : > { %p1755_p0 = scmp.ge.s32.totalorder %s2340_s21, 1  ;;  %p2922_p1 = scmp.eq.s32.totalorder %s2459_s24, 0 }
  0x1a   : > { %p406_p2 = scmp.lt.s32.totalorder %s2340_s21, 3  ;;  %s2343_s26 = smov [#allocation11]  }
  0x1b   : > { %s459_s27 = sshll.u32 %s2343_s26, 4  ;;  %s2057_s29 = scalar_lea.vmem %s419_s23, 256  ;;  %s460_s27 = int_to_ptr.vmem [resolvable:$true] %s459_s27 }
  0x1c   : > { %p2464_p3 = pnand %p1755_p0, %p406_p2  ;;  %p2058_p8 = scmp.ne.s32.totalorder %s419_s23, %s2057_s29 }
  0x1d   : > { %p2065_p11 = scmp.lt.s32.totalorder %s419_s23, %s419_s23  ;;  %p2066_p12 = scmp.lt.s32.totalorder %s2057_s29, %s2057_s29 }
  0x1e   : > { %s2944_s25 = scalar_select %p2464_p3, 1, 0 }
  0x1f   : > { %p1949_p5 = pneg %p2464_p3  ;;  %p2067_p13 = por %p2066_p12, %p2065_p11 }
  0x21   : > { %p2473_p6 = pnand %p1949_p5, %p2922_p1 }
  0x23   : > { %s2945_s28 = scalar_select %p2473_p6, 1, 0 }
  0x24   : > { %p2908_p7 = pneg %p2473_p6 }
  0x26   : > { %p2060_p9 = pnand %p2058_p8, %p2908_p7 }
  0x28   : > { %p2061_p10 = pneg %p2060_p9 }
  0x2a   : > { %p2068_p0 = pnand %p2067_p13, %p2061_p10 }
  0x2c   : > { %2071 = shalt.err (!%p2068_p0)
}
  0x2d   : > { %s2909_s30 = smov 128   ;;  %s2911_s16 = smov 8  }
  0x2e   : > { %s2946_s3 = sld [smem:[#allocation31_spill]]  ;;  %s2083_s26 = scalar_lea.vmem %s460_s27, 256 }
  0x2f   : > { %p2084_p2 = scmp.ne.s32.totalorder %s460_s27, %s2083_s26  ;;  %p2091_p9 = scmp.lt.s32.totalorder %s460_s27, %s460_s27 }
  0x30   : > { %p2092_p10 = scmp.lt.s32.totalorder %s2083_s26, %s2083_s26 }
  0x31   : > { %p2086_p5 = pnand %p2084_p2, %p2908_p7 }
  0x32   : > { %p2093_p11 = por %p2092_p10, %p2091_p9 }
  0x33   : > { %p2087_p8 = pneg %p2086_p5 }
  0x34   : > { %1952 = dma.hbm_to_vmem [thread:$0]  (!%p2473_p6), %s2946_s3, 256, %s419_s23, [#allocation9], %s2909_s30, %s2909_s30, %s2911_s16  }
  0x35   : > { %p2094_p12 = pnand %p2093_p11, %p2087_p8 }
  0x37   : > { %2097 = shalt.err (!%p2094_p12)
}
  0x38   : > { %s2947_s10 = sld [smem:[#allocation34_spill]]  ;;  %s1754_s23 = sadd.s32 4294967294, %s2340_s21  }
  0x39   : > { %s2503_s17 = sadd.s32 1, %s2340_s21   ;;  %s47_s22 = sadd.s32 1, %s2336_s20 }
  0x3a   : > { %2948 = sst [smem:[#allocation26_spill]] %s2503_s17  ;;  %s44_s14 = ssub.s32 %s2340_s21, %s2503_s17 }
  0x3b   : > { %p45_p13 = scmp.eq.s32.totalorder %s44_s14, 0  ;;  %p54_p0 = scmp.ne.s32.totalorder %s2336_s20, %s2332_s19 }
  0x3c   : > { %p55_p2 = scmp.eq.s32.totalorder %s2340_s21, 0  ;;  %p60_p5 = scmp.ne.s32.totalorder %s2332_s19, %s2328_s18 }
  0x3d   : > { %s2514_s26 = scalar_select %p45_p13, %s2336_s20, %s47_s22  }
  0x3e   : > { %1958 = dma.hbm_to_vmem [thread:$0]  (!%p2473_p6), %s2947_s10, 256, %s460_s27, [#allocation12], %s2909_s30, %s2909_s30, %s2911_s16  }
  0x3f   : > { %2949 = sst [smem:[#allocation27_spill]] %s2514_s26  ;;  %p56_p8 = por %p55_p2, %p54_p0 }
  0x40   : > { %p2518_p9 = por %p2922_p1, %p60_p5  ;;  %p367_p10 = scmp.eq.s32.totalorder %s2459_s24, 1 }
  0x41   : > { %p373_p11 = scmp.eq.s32.totalorder %s1754_s23, 1  ;;  %p1983_p12 = scmp.lt.s32.totalorder %s2340_s21, 2 }
  0x42   : > { %s2950_s29 = scalar_select %p2518_p9, 1, 0 }
  0x43   : > { %s2525_s27 = sand.u32 1, %s2336_s20   ;;  %p2527_p4 = por %p367_p10, %p54_p0 }
  0x44   : > { %p2531_p7 = por %p373_p11, %p60_p5  ;;  %p2536_p13 = pnand %p1983_p12, %p56_p8 }
  0x45   : > { %s2951_s14 = scalar_select %p2527_p4, 1, 0 }
  0x46   : > { %s2953_s22 = scalar_select %p2531_p7, 1, 0 }
  0x47   : > { %2952 = sst [smem:[#allocation28_spill]] %s2951_s14  ;;  %s513_s23 = sand.u32 1, %s2340_s21  }
  0x48   : > { %2954 = sst [smem:[#allocation29_spill]] %s2953_s22  ;;  %s1764_s3 = sshll.u32 %s2340_s21, 4 }
  0x49   : > { %s516_s10 = scalar_lea.vmem [#allocation5], %s2525_s27  ;;  %s2956_s1 = sld [smem:[#allocation30_spill]] }
  0x4a   : > { %s523_s26 = sshll.u32 %s516_s10, 4  ;;  %s2546_s15 = scalar_lea.sflag [#allocation6], %s513_s23  ;;  %s524_s26 = int_to_ptr.vmem [resolvable:$true] %s523_s26 }
  0x4b   : > { %p2550_p2 = pneg %p2536_p13 }
  0x4f   : > { %s521_s18 = scalar_lea.hbm %s2956_s1, %s1764_s3  ;;  %s2103_s8 = scalar_lea.hbm %s2956_s1, 32 }
  0x50   : > { %s2098_s14 = scalar_lea.hbm %s521_s18, 16  ;;  %p2104_p10 = scmp.lt.s32.totalorder %s521_s18, %s2956_s1 }
  0x51   : > { %p2099_p0 = scmp.ne.s32.totalorder %s521_s18, %s2098_s14  ;;  %p2105_p11 = scmp.lt.s32.totalorder %s2103_s8, %s2098_s14 }
  0x53   : > { %p2101_p5 = pnand %p2550_p2, %p2099_p0  ;;  %p2106_p12 = por %p2105_p11, %p2104_p10 }
  0x55   : > { %p2102_p8 = pneg %p2101_p5 }
  0x57   : > { %p2107_p1 = pnand %p2106_p12, %p2102_p8 }
  0x59   : > { %2110 = shalt.err (!%p2107_p1)
}
  0x5a   : > { %s2111_s17 = scalar_lea.vmem %s524_s26, 16  ;;  %s2346_s23 = smov [#allocation5]  }
  0x5b   : > { %p2112_p7 = scmp.ne.s32.totalorder %s524_s26, %s2111_s17  ;;  %s2116_s11 = sshll.u32 %s2346_s23, 4  ;;  %s2117_s11 = int_to_ptr.vmem [resolvable:$false] %s2116_s11 }
  0x5c   : > { %s2118_s13 = scalar_lea.vmem %s2117_s11, 32  ;;  %p2119_p0 = scmp.lt.s32.totalorder %s524_s26, %s2117_s11 }
  0x5d   : > { %p2114_p4 = pnand %p2112_p7, %p2550_p2  ;;  %p2120_p5 = scmp.lt.s32.totalorder %s2118_s13, %s2111_s17 }
  0x5f   : > { %p2115_p9 = pneg %p2114_p4  ;;  %p2121_p3 = por %p2120_p5, %p2119_p0 }
  0x61   : > { %p2122_p6 = pnand %p2121_p3, %p2115_p9 }
  0x63   : > { %2125 = shalt.err (!%p2122_p6)
}
  0x64   : > { %1968 = dma.hbm_to_vmem [thread:$0]  (!%p2536_p13), %s521_s18, 16, %s524_s26, %s2546_s15  }
  0x65   : > { %s2958_s8 = sshll.u32 %s2525_s27, 4  ;;  %s2347_s10 = smov [#allocation10]  }
  0x66   : > { %s534_s14 = scalar_lea.vmem [#allocation7], %s2958_s8  ;;  %s431_s20 = sshll.u32 %s2347_s10, 4  ;;  %s432_s20 = int_to_ptr.vmem [resolvable:$true] %s431_s20 }
  0x67   : > { %s541_s22 = sshll.u32 %s534_s14, 4  ;;  %s2137_s3 = scalar_lea.vmem %s432_s20, 256  ;;  %s2569_s22 = int_to_ptr.vmem [resolvable:$true] %s541_s22 }
  0x68   : > { %p2138_p1 = scmp.ne.s32.totalorder %s432_s20, %s2137_s3  ;;  %p2959_p4 = scmp.ne.s32.totalorder %s2945_s28, 0 }
  0x69   : > { %p2145_p9 = scmp.lt.s32.totalorder %s432_s20, %s432_s20  ;;  %p2146_p8 = scmp.lt.s32.totalorder %s2137_s3, %s2137_s3 }
  0x6a   : > { %p2960_p7 = pneg %p2959_p4 }
  0x6b   : > { %p2147_p10 = por %p2146_p8, %p2145_p9 }
  0x6c   : > { %p2140_p3 = pnand %p2138_p1, %p2960_p7 }
  0x6e   : > { %p2141_p6 = pneg %p2140_p3 }
  0x70   : > { %p2148_p11 = pnand %p2147_p10, %p2141_p6 }
  0x72   : > { %2151 = shalt.err (!%p2148_p11)
}
  0x73   : > { %s2961_s11 = smov 8   ;;  %s2962_s13 = smov 128  }
  0x74   : > { %s2963_s4 = sld [smem:[#allocation32_spill]]  ;;  %s2348_s17 = smov [#allocation13]  }
  0x75   : > { %s475_s23 = sshll.u32 %s2348_s17, 4  ;;  %s1820_s8 = sshll.u32 %s2340_s21, 8  ;;  %s476_s23 = int_to_ptr.vmem [resolvable:$true] %s475_s23 }
  0x76   : > { %s2163_s14 = scalar_lea.vmem %s476_s23, 256  ;;  %p2964_p0 = pmov %p2960_p7 }
  0x77   : > { %p2164_p12 = scmp.ne.s32.totalorder %s476_s23, %s2163_s14  ;;  %p2171_p7 = scmp.lt.s32.totalorder %s476_s23, %s476_s23 }
  0x78   : > { %p2172_p3 = scmp.lt.s32.totalorder %s2163_s14, %s2163_s14 }
  0x79   : > { %p2166_p5 = pnand %p2164_p12, %p2964_p0 }
  0x7a   : > { %1955 = dma.hbm_to_vmem [thread:$0]  (!%p2959_p4), %s2963_s4, 256, %s432_s20, [#allocation9], %s2962_s13, %s2962_s13, %s2961_s11  }
  0x7b   : > { %p2167_p1 = pneg %p2166_p5  ;;  %p2173_p6 = por %p2172_p3, %p2171_p7 }
  0x7d   : > { %p2174_p9 = pnand %p2173_p6, %p2167_p1 }
  0x7f   : > { %2177 = shalt.err (!%p2174_p9)
}
  0x80   : > { %s2965_s12 = sld [smem:[#allocation36_spill]]  ;;  %s2597_s26 = scalar_lea.hbm %s2891_s0, %s1820_s8 }
  0x81   : > { %s2966_s17 = sshll.u32 %s2525_s27, 4  ;;  %s2606_s10 = scalar_lea.hbm %s2893_s2, %s1820_s8 }
  0x82   : > { %s496_s28 = scalar_lea.vmem [#allocation2], %s2966_s17  ;;  %s493_s20 = scalar_lea.sflag [#allocation3], %s2525_s27 }
  0x83   : > { %s503_s14 = sshll.u32 %s496_s28, 4  ;;  %p2184_p11 = scmp.lt.s32.totalorder %s2597_s26, %s2891_s0  ;;  %s2601_s14 = int_to_ptr.vmem [resolvable:$true] %s503_s14 }
  0x86   : > { %1961 = dma.hbm_to_vmem [thread:$0]  (!%p2959_p4), %s2965_s12, 256, %s476_s23, [#allocation12], %s2962_s13, %s2962_s13, %s2961_s11  }
  0x87   : > { %s2178_s23 = scalar_lea.hbm %s2597_s26, 256  ;;  %s2183_s12 = scalar_lea.hbm %s2891_s0, 512 }
  0x88   : > { %p2179_p4 = scmp.ne.s32.totalorder %s2597_s26, %s2178_s23  ;;  %p2185_p12 = scmp.lt.s32.totalorder %s2183_s12, %s2178_s23 }
  0x8a   : > { %p2181_p8 = pnand %p2179_p4, %p2550_p2  ;;  %p2186_p0 = por %p2185_p12, %p2184_p11 }
  0x8c   : > { %p2182_p10 = pneg %p2181_p8 }
  0x8e   : > { %p2187_p5 = pnand %p2186_p0, %p2182_p10 }
  0x90   : > { %2190 = shalt.err (!%p2187_p5)
}
  0x91   : > { %s2191_s1 = scalar_lea.vmem %s2601_s14, 256  ;;  %s2349_s4 = smov [#allocation2]  }
  0x92   : > { %p2192_p1 = scmp.ne.s32.totalorder %s2601_s14, %s2191_s1  ;;  %s2196_s27 = sshll.u32 %s2349_s4, 4  ;;  %s2197_s27 = int_to_ptr.vmem [resolvable:$false] %s2196_s27 }
  0x93   : > { %s2198_s8 = scalar_lea.vmem %s2197_s27, 512  ;;  %p2199_p6 = scmp.lt.s32.totalorder %s2601_s14, %s2197_s27 }
  0x94   : > { %p2194_p7 = pnand %p2192_p1, %p2550_p2  ;;  %p2200_p9 = scmp.lt.s32.totalorder %s2198_s8, %s2191_s1 }
  0x96   : > { %p2195_p3 = pneg %p2194_p7  ;;  %p2201_p4 = por %p2200_p9, %p2199_p6 }
  0x98   : > { %p2202_p8 = pnand %p2201_p4, %p2195_p3 }
  0x9a   : > { %2205 = shalt.err (!%p2202_p8)
}
  0x9b   : > { %1965 = dma.hbm_to_vmem [thread:$0]  (!%p2536_p13), %s2597_s26, 256, %s2601_s14, %s493_s20, %s2962_s13, %s2962_s13, %s2961_s11  }
  0x9c   : > { %s2206_s12 = scalar_lea.hbm %s2606_s10, 256  ;;  %s2211_s23 = scalar_lea.hbm %s2893_s2, 512 }
  0x9d   : > { %p2207_p10 = scmp.ne.s32.totalorder %s2606_s10, %s2206_s12  ;;  %p2212_p0 = scmp.lt.s32.totalorder %s2606_s10, %s2893_s2 }
  0x9e   : > { %p2213_p5 = scmp.lt.s32.totalorder %s2211_s23, %s2206_s12 }
  0x9f   : > { %p2209_p11 = pnand %p2207_p10, %p2550_p2 }
  0xa0   : > { %p2214_p1 = por %p2213_p5, %p2212_p0 }
  0xa1   : > { %p2210_p12 = pneg %p2209_p11 }
  0xa3   : > { %p2215_p7 = pnand %p2214_p1, %p2210_p12 }
  0xa5   : > { %2218 = shalt.err (!%p2215_p7)
}
  0xa6   : > { %s2219_s26 = scalar_lea.vmem %s2569_s22, 256  ;;  %s2350_s14 = smov [#allocation7]  }
  0xa7   : > { %p2220_p3 = scmp.ne.s32.totalorder %s2569_s22, %s2219_s26  ;;  %s2224_s20 = sshll.u32 %s2350_s14, 4  ;;  %s2225_s20 = int_to_ptr.vmem [resolvable:$false] %s2224_s20 }
  0xa8   : > { %s2226_s17 = scalar_lea.vmem %s2225_s20, 512  ;;  %p2227_p4 = scmp.lt.s32.totalorder %s2569_s22, %s2225_s20 }
  0xa9   : > { %p2222_p6 = pnand %p2220_p3, %p2550_p2  ;;  %p2228_p8 = scmp.lt.s32.totalorder %s2226_s17, %s2219_s26 }
  0xab   : > { %p2223_p9 = pneg %p2222_p6  ;;  %p2229_p10 = por %p2228_p8, %p2227_p4 }
  0xad   : > { %p2230_p11 = pnand %p2229_p10, %p2223_p9 }
  0xaf   : > { %2233 = shalt.err (!%p2230_p11)
}
  0xb0   : > { %1971 = dma.hbm_to_vmem [thread:$0]  (!%p2536_p13), %s2606_s10, 256, %s2569_s22, %s2546_s15, %s2962_s13, %s2962_s13, %s2961_s11  }
  0xb1   : > { %p2967_p2 = scmp.ne.s32.totalorder %s2944_s25, 0 }
  0xb2   : > { %s2659_s30 = sand.u32 (!%p2967_p2), 1, %s2332_s19   ;;  %p2968_p12 = scmp.ne.s32.totalorder (!%p2967_p2), %s2950_s29, 0 }
  0xb3   : > { %553 = sbr.rel (%p2967_p2) target bundleno = 1073 (0x431), region = 76  ;;  %s2662_s1 = sshll.u32 (!%p2967_p2), %s2659_s30, 4 }
  0xb4   : > { %s556_s16 = scalar_lea.sflag (!%p2967_p2), [#allocation3], %s2659_s30  ;;  %s559_s4 = scalar_lea.vmem (!%p2967_p2), [#allocation2], %s2662_s1 }
  0xb8   : > { %2303 = dma.done.wait (%p2968_p12), %s556_s16, 256  }
  0xb9   : > { %2305 = vsyncadd (%p2968_p12), %s556_s16, 4294967040  ;;  %s564_s15 = sand.u32 1, %s2459_s24   ;;  %s567_s22 = scalar_lea.vmem [#allocation5], %s2659_s30 }
  0xba   : > { %s565_s25 = scalar_lea.sflag [#allocation6], %s564_s15 }
  0xbb   : > { %2307 = dma.done.wait (%p2968_p12), %s565_s25, 272  }
  0xbc   : > { %2309 = vsyncadd (%p2968_p12), %s565_s25, 4294967024  ;;  %s576_s11 = scalar_lea.vmem [#allocation7], %s2662_s1  ;;  %p2969_p13 = scmp.eq.s32.totalorder %s2459_s24, 0 }
  0xbe   : > { %2311 = dma.done.wait (%p2969_p13), [#allocation9], 512   ;;  %p2970_p0 = pmov %p2969_p13 }
  0xc0   : > { %2313 = vsyncadd (%p2970_p0), [#allocation9], 4294966784  ;;  %p2971_p5 = pmov %p2970_p0 }
  0xc1   : > { %p2972_p1 = pmov %p2970_p0 }
  0xc2   : > { %2315 = dma.done.wait (%p2971_p5), [#allocation12], 512  }
  0xc3   : > { %2317 = vsyncadd (%p2972_p1), [#allocation12], 4294966784  ;;  %v1777_v0 = vld [vmem:[%s567_s22] ss:$0 sm:$0xff]  ;;  %vm668_vm0 = vcmask 130048   ;;  %v658_v2 = vld [vmem:[#allocation10] sm:$0xff]  ;;  %v774_v40 = vlaneseq }
  0xc4   : > { %v659_v1 = vld [vmem:[#allocation10 + $0x8] sm:$0xff]  ;;  %v666_v4 = vmul.f32 %v1777_v0, %v658_v2  ;;  %v679_v7 = vld [vmem:[#allocation8] sm:$0xff]  ;;  %v680_v9 = vld [vmem:[#allocation8 + $0x8] sm:$0xff]  ;;  %v2351_v11 = vmov 0   ;;  %s2352_s23 = smov 3   ;;  %s2353_s20 = smov 125  }
  0xc5   : > { %v667_v3 = vmul.f32 %v1777_v0, %v659_v1  ;;  %v2685_v5 = vld [vmem:[%s559_s4 + $0x8] sm:$0xff]  ;;  %v2687_v6 = vld [vmem:[%s559_s4] sm:$0xff]  ;;  %1864 = vmatprep.mubr.msk.f32.mxu0 %vm668_vm0, %v679_v7  ;;  %2032 = vset.pattern.permute.xlu1 %v2351_v11  ;;  %s2973_s13 = sld [smem:[#allocation37_spill]]  ;;  %v775_v41 = vand.u32 127, %v774_v40  ;;  %s652_s3 = scalar_lea.vmem [#allocation15], %s2662_s1 }
  0xc6   : > { %1860 = vmatprep.subr.mxu0 %v2685_v5  ;;  %v669_v10 = vsel %vm668_vm0, %v666_v4, 0.0  ;;  %2033 = vset.pattern.permute.xlu0 %v2351_v11  ;;  %v676_v12 = vld [vmem:[%s2896_s5 + $0x8] sm:$0xff]  ;;  %v675_v15 = vld [vmem:[%s2896_s5] sm:$0xff]  ;;  %v1780_v20 = vld [vmem:[%s2897_s6 + $0x10] sm:$0xff]  ;;  %s2975_s16 = sld [smem:[#allocation33_spill]]  ;;  %s1571_s18 = sshll.u32 %s652_s3, 4  ;;  %s2801_s18 = int_to_ptr.vmem [resolvable:$true] %s1571_s18 }
  0xc7   : > { %v672_v8 = vsel %vm668_vm0, %v667_v3, 0.0  ;;  %1861 = vmatpush3.msra.mxu0 %v2685_v5  ;;  %v790_v18 = vld [vmem:[%s2897_s6] sm:$0xff]  ;;  %1871 = vmatprep.mubr.msk.f32.mxu1 %vm668_vm0, %v1780_v20  ;;  %v1781_v30 = vld [vmem:[%s2897_s6 + $0x18] sm:$0xff]  ;;  %v1311_v32 = vld [vmem:[%s2900_s9 + $0x8] sm:$0xff]  ;;  %vm776_vm1 = vcmp.ge.s32.totalorder %v775_v41, 3  ;;  %vm783_vm2 = vcmp.lt.s32.totalorder %v775_v41, 125 }
  0xc8   : > { %673 = vadd.xlane.f32.xlu0 %v672_v8  ;;  %1862 = vmatprep.subr.mxu0 %v2687_v6  ;;  %v656_v22 = vld [vmem:[%s576_s11 + $0x8] sm:$0xff]  ;;  %v655_v27 = vld [vmem:[%s576_s11] sm:$0xff]  ;;  %s1822_s26 = sshll.u32 %s2459_s24, 8  ;;  %s2804_s14 = scalar_lea.vmem [#allocation14], %s2662_s1 }
  0xc9   : > { %1863 = vmatpush3.msra.mxu0 %v2687_v6  ;;  %v1788_v31 = vld [vmem:[%s2897_s6 + $0x20] sm:$0xff]  ;;  %v1044_v34 = vld [vmem:[%s2898_s7 + $0x8] sm:$0xff]  ;;  %v1435_v55 = vld [vmem:[#allocation13] sm:$0xff]  ;;  %s2976_s17 = sld [smem:[#allocation28_spill]]  ;;  %s1542_s10 = scalar_lea.sflag [#allocation16], %s2659_s30 }
  0xca   : > { %1865 = vmatmul.mubr.msk.f32.vlgmr.msra.gmra.mxu0 %vm668_vm0, %v680_v9  ;;  %v1310_v33 = vld [vmem:[%s2900_s9] sm:$0xff]  ;;  %v791_v44 = vld [vmem:[%s2897_s6 + $0x8] sm:$0xff]  ;;  %s2977_s15 = sld [smem:[#allocation39_spill]]  ;;  %s2234_s27 = scalar_lea.vmem %s2801_s18, 256 }
  0xcb   : > { %1878 = vmatprep.mubr.msk.f32.mxu0 %vm668_vm0, %v790_v18  ;;  %v1437_v35 = vld [vmem:[%s2973_s13] sm:$0xff]  ;;  %v1438_v36 = vld [vmem:[%s2973_s13 + $0x8] sm:$0xff]  ;;  %s2978_s11 = sld [smem:[#allocation38_spill]]  ;;  %p2235_p7 = scmp.ne.s32.totalorder %s2801_s18, %s2234_s27 }
  0xcc   : > { %670 = vadd.xlane.f32.xlu0 %v669_v10  ;;  %v1043_v37 = vld [vmem:[%s2898_s7] sm:$0xff]  ;;  %v1794_v45 = vld [vmem:[%s2975_s16 + $0x10] sm:$0xff]  ;;  %v1795_v47 = vld [vmem:[%s2975_s16 + $0x18] sm:$0xff]  ;;  %s2354_s8 = smov [#allocation15]  }
  0xcd   : > { %v1802_v48 = vld [vmem:[%s2975_s16 + $0x20] sm:$0xff]  ;;  %v1789_v50 = vld [vmem:[%s2897_s6 + $0x28] sm:$0xff]  ;;  %s2238_s12 = sshll.u32 %s2354_s8, 4  ;;  %s2239_s12 = int_to_ptr.vmem [resolvable:$false] %s2238_s12 }
  0xce   : > { %v1057_v51 = vld [vmem:[%s2975_s16] sm:$0xff]  ;;  %v1803_v52 = vld [vmem:[%s2975_s16 + $0x28] sm:$0xff]  ;;  %s2240_s21 = scalar_lea.vmem %s2239_s12, 512  ;;  %p2241_p4 = scmp.lt.s32.totalorder %s2801_s18, %s2239_s12 }
  0xcf   : > { %v1058_v53 = vld [vmem:[%s2975_s16 + $0x8] sm:$0xff]  ;;  %p2979_p3 = scmp.ne.s32.totalorder %s2976_s17, 0  ;;  %p2242_p8 = scmp.lt.s32.totalorder %s2240_s21, %s2234_s27 }
  0xd0   : > { %v1340_v54 = vld [vmem:[#allocation11] sm:$0xff]  ;;  %s2811_s25 = scalar_lea.hbm %s2977_s15, %s1822_s26 }
  0xd1   : > { %s2820_s29 = scalar_lea.hbm %s2978_s11, %s1822_s26  ;;  %p2236_p6 = pnand %p2235_p7, %p2979_p3 }
  0xd2   : > { %p2243_p10 = por %p2242_p8, %p2241_p4 }
  0xd3   : > { %p2237_p9 = pneg %p2236_p6 }
  0xd5   : > { %p2244_p11 = pnand %p2243_p10, %p2237_p9 }
 0x151   : > { %v674_v13 = vpop.xlane.xlu0 %673 }
 0x152   : > { %v678_v14 = vadd.f32 %v676_v12, %v674_v13 }
 0x154   : > { %688 = vperm.xlu1 %2032, %v678_v14  }
 0x155   : > { %v671_v16 = vpop.xlane.xlu0 %670 }
 0x156   : > { %v677_v17 = vadd.f32 %v675_v15, %v671_v16 }
 0x158   : > { %683 = vperm.xlu1 %2032, %v677_v17  }
 0x18a   : > { %v1866_v19 = vpop.f32.mrf.mxu0 }
 0x18c   : > { %v763_v25 = vpop.f32.mrf.mxu0 }
 0x1cf   : > { %v689_v21 = vpop.permute.xlu1 %688 }
 0x1d0   : > { %v769_v23 = vadd.f32 %v1866_v19, %v689_v21 }
 0x1d2   : > { %v773_v24 = vadd.f32 %v769_v23, %v656_v22 }
 0x1d3   : > { %v684_v26 = vpop.permute.xlu1 %683 }
 0x1d4   : > { %v764_v28 = vadd.f32 %v763_v25, %v684_v26  ;;  %779 = vrot.lane.b32.xlu0 %v773_v24, %s2352_s23  ;;  %1867 = vmatprep.subr.mxu1 %v773_v24 }
 0x1d5   : > { %1868 = vmatpush3.msra.mxu1 %v773_v24 }
 0x1d6   : > { %v772_v29 = vadd.f32 %v764_v28, %v655_v27 }
 0x1d8   : > { %777 = vrot.lane.b32.xlu1 %v772_v29, %s2352_s23  ;;  %1869 = vmatprep.subr.mxu1 %v772_v29  ;;  %s2974_s23 = sld [smem:[#allocation35_spill]] }
 0x1d9   : > { %1870 = vmatpush3.msra.mxu1 %v772_v29  ;;  %1047 = vperm.xlu0 %2033, %v1043_v37   ;;  %v1436_v37 = vld [vmem:[#allocation13 + $0x8] sm:$0xff] }
 0x1da   : > { %1872 = vmatmul.mubr.msk.f32.vlgmr.msra.gmra.mxu1 %vm668_vm0, %v1781_v30 }
 0x1db   : > { %1885 = vmatprep.mubr.msk.f32.mxu1 %vm668_vm0, %v1788_v31 }
 0x1dc   : > { %786 = vrot.lane.b32.xlu1 %v773_v24, %s2353_s20 }
 0x1de   : > { %v1343_v38 = vld [vmem:[%s2974_s23 + $0x8] sm:$0xff]  ;;  %v1342_v39 = vld [vmem:[%s2974_s23] sm:$0xff] }
 0x1df   : > { %1346 = vperm.xlu0 %2033, %v1342_v39  }
 0x1e0   : > { %784 = vrot.lane.b32.xlu1 %v772_v29, %s2353_s20  ;;  %s1555_s20 = sshll.u32 %s2804_s14, 4  ;;  %s2813_s20 = int_to_ptr.vmem [resolvable:$true] %s1555_s20 }
 0x1e4   : > { %1319 = vperm.xlu1 %2032, %v1311_v32  }
 0x1e8   : > { %1314 = vperm.xlu1 %2032, %v1310_v33  }
 0x1ec   : > { %1052 = vperm.xlu1 %2032, %v1044_v34  }
 0x1f0   : > { %1441 = vperm.xlu1 %2032, %v1437_v35  }
 0x1f4   : > { %1446 = vperm.xlu1 %2032, %v1438_v36   ;;  %v1341_v36 = vld [vmem:[#allocation11 + $0x8] sm:$0xff] }
 0x1f8   : > { %1351 = vperm.xlu1 %2032, %v1343_v38  }
 0x246   : > { %v780_v42 = vpop.permute.xlu0 %779 }
 0x247   : > { %1874 = vmatprep.subr.msk.mxu0 %vm776_vm1, %v780_v42 }
 0x248   : > { %1875 = vmatpush3.msk.msra.mxu0 %vm776_vm1, %v780_v42 }
 0x24a   : > { %v778_v43 = vpop.permute.xlu1 %777 }
 0x24b   : > { %1876 = vmatprep.subr.msk.mxu0 %vm776_vm1, %v778_v43 }
 0x24c   : > { %1877 = vmatpush3.msk.msra.mxu0 %vm776_vm1, %v778_v43 }
 0x24d   : > { %1888 = vmatprep.subr.mxu0 %v773_v24  ;;  %1879 = vmatmul.mubr.msk.f32.vlgmr.msra.gmra.mxu0 %vm668_vm0, %v791_v44 }
 0x24e   : > { %1889 = vmatpush3.msra.mxu0 %v773_v24  ;;  %v787_v46 = vpop.permute.xlu1 %786  ;;  %1892 = vmatprep.mubr.msk.f32.mxu0 %vm668_vm0, %v1794_v45 }
 0x24f   : > { %1881 = vmatprep.subr.msk.mxu1 %vm783_vm2, %v787_v46  ;;  %1890 = vmatprep.subr.mxu0 %v772_v29 }
 0x250   : > { %1882 = vmatpush3.msk.msra.mxu1 %vm783_vm2, %v787_v46  ;;  %1891 = vmatpush3.msra.mxu0 %v772_v29 }
 0x251   : > { %1902 = vmatprep.subr.msk.mxu0 %vm783_vm2, %v787_v46  ;;  %1893 = vmatmul.mubr.msk.f32.vlgmr.msra.gmra.mxu0 %vm668_vm0, %v1795_v47 }
 0x252   : > { %1903 = vmatpush3.msk.msra.mxu0 %vm783_vm2, %v787_v46  ;;  %v785_v49 = vpop.permute.xlu1 %784  ;;  %1906 = vmatprep.mubr.msk.f32.mxu0 %vm668_vm0, %v1802_v48 }
 0x253   : > { %1883 = vmatprep.subr.msk.mxu1 %vm783_vm2, %v785_v49  ;;  %1904 = vmatprep.subr.msk.mxu0 %vm783_vm2, %v785_v49 }
 0x254   : > { %1884 = vmatpush3.msk.msra.mxu1 %vm783_vm2, %v785_v49  ;;  %1905 = vmatpush3.msk.msra.mxu0 %vm783_vm2, %v785_v49  ;;  %v1048_v23 = vpop.permute.xlu0 %1047 }
 0x255   : > { %1886 = vmatmul.mubr.msk.f32.vlgmr.msra.gmra.mxu1 %vm668_vm0, %v1789_v50  ;;  %1895 = vmatprep.subr.msk.mxu1 %vm776_vm1, %v780_v42 }
 0x256   : > { %1896 = vmatpush3.msk.msra.mxu1 %vm776_vm1, %v780_v42  ;;  %1899 = vmatprep.mubr.msk.f32.mxu1 %vm668_vm0, %v1057_v51 }
 0x257   : > { %1897 = vmatprep.subr.msk.mxu1 %vm776_vm1, %v778_v43  ;;  %1907 = vmatmul.mubr.msk.f32.vlgmr.msra.gmra.mxu0 %vm668_vm0, %v1803_v52 }
 0x258   : > { %1898 = vmatpush3.msk.msra.mxu1 %vm776_vm1, %v778_v43  ;;  %1920 = vmatprep.mubr.msk.f32.mxu0 %vm668_vm0, %v1435_v55 }
 0x259   : > { %1900 = vmatmul.mubr.msk.f32.vlgmr.msra.gmra.mxu1 %vm668_vm0, %v1058_v53 }
 0x25a   : > { %1913 = vmatprep.mubr.msk.f32.mxu1 %vm668_vm0, %v1340_v54  ;;  %v1347_v43 = vpop.permute.xlu0 %1346 }
 0x25f   : > { %v1320_v0 = vpop.permute.xlu1 %1319 }
 0x263   : > { %v1315_v12 = vpop.permute.xlu1 %1314 }
 0x267   : > { %v1053_v22 = vpop.permute.xlu1 %1052 }
 0x26b   : > { %v1442_v38 = vpop.permute.xlu1 %1441 }
 0x26f   : > { %v1447_v39 = vpop.permute.xlu1 %1446 }
 0x273   : > { %v1352_v40 = vpop.permute.xlu1 %1351 }
 0x29a   : > { %v1873_v57 = vpop.f32.mrf.mxu1 }
 0x29c   : > { %v867_v60 = vpop.f32.mrf.mxu1 }
 0x30d   : > { %v1880_v56 = vpop.f32.mrf.mxu0 }
 0x30e   : > { %v954_v18 = vadd.f32 %v1880_v56, %v1873_v57 }
 0x30f   : > { %v948_v58 = vpop.f32.mrf.mxu0 }
 0x310   : > { %v949_v19 = vadd.f32 %v948_v58, %v867_v60 }
 0x311   : > { %v1894_v59 = vpop.f32.mrf.mxu0 }
 0x313   : > { %v1134_v62 = vpop.f32.mrf.mxu0 }
 0x315   : > { %v1887_v61 = vpop.f32.mrf.mxu1 }
 0x316   : > { %v1042_v20 = vadd.f32 %v1887_v61, %v954_v18 }
 0x317   : > { %v1032_v63 = vpop.f32.mrf.mxu1  ;;  %v1908_v2 = vpop.f32.mrf.mxu0 }
 0x318   : > { %v1041_v21 = vadd.f32 %v1032_v63, %v949_v19  ;;  %v1056_v24 = vadd.f32 %v1053_v22, %v1042_v20 }
 0x319   : > { %v1901_v1 = vpop.f32.mrf.mxu1  ;;  %v1299_v9 = vpop.f32.mrf.mxu0 }
 0x31a   : > { %v1221_v3 = vadd.f32 %v1901_v1, %v1894_v59  ;;  %v1055_v26 = vadd.f32 %v1048_v23, %v1041_v21 }
 0x31b   : > { %v1215_v4 = vpop.f32.mrf.mxu1 }
 0x31c   : > { %v1309_v7 = vadd.f32 %v1908_v2, %v1221_v3  ;;  %v1216_v8 = vadd.f32 %v1215_v4, %v1134_v62 }
 0x31e   : > { %v1323_v10 = vadd.f32 %v1320_v0, %v1309_v7  ;;  %v1308_v11 = vadd.f32 %v1299_v9, %v1216_v8 }
 0x320   : > { %v1327_v13 = vsub.f32 0.0, %v1323_v10  ;;  %v1322_v14 = vadd.f32 %v1315_v12, %v1308_v11 }
 0x322   : > { %v1330_v15 = vmul.f32 1.442695, %v1327_v13  ;;  %v1326_v16 = vsub.f32 0.0, %v1322_v14 }
 0x324   : > { %2034 = vpow2.f32 %v1330_v15  ;;  %v1328_v17 = vmul.f32 1.442695, %v1326_v16 }
 0x326   : > { %2036 = vpow2.f32 %v1328_v17 }
 0x327   : > { %2038 = vtanh.f32 %v1056_v24 }
 0x331   : > { %v2035_v25 = vpop.eup %2034 }
 0x332   : > { %v1333_v27 = vadd.f32 1.0, %v2035_v25 }
 0x333   : > { %v2037_v28 = vpop.eup %2036 }
 0x334   : > { %2040 = vrcp.f32 %v1333_v27  ;;  %v1332_v29 = vadd.f32 1.0, %v2037_v28  ;;  %v2039_v30 = vpop.eup %2038 }
 0x335   : > { %2042 = vtanh.f32 %v1055_v26 }
 0x336   : > { %2044 = vrcp.f32 %v1332_v29 }
 0x341   : > { %v2041_v31 = vpop.eup %2040 }
 0x342   : > { %v2043_v32 = vpop.eup %2042  ;;  %v1339_v33 = vmul.f32 %v2041_v31, %v2039_v30 }
 0x343   : > { %v2045_v34 = vpop.eup %2044 }
 0x344   : > { %1909 = vmatprep.subr.mxu1 %v1339_v33  ;;  %1916 = vmatprep.subr.mxu0 %v1339_v33  ;;  %v1338_v35 = vmul.f32 %v2045_v34, %v2043_v32 }
 0x345   : > { %1910 = vmatpush3.msra.mxu1 %v1339_v33  ;;  %1917 = vmatpush3.msra.mxu0 %v1339_v33 }
 0x346   : > { %1911 = vmatprep.subr.mxu1 %v1338_v35  ;;  %1918 = vmatprep.subr.mxu0 %v1338_v35 }
 0x347   : > { %1912 = vmatpush3.msra.mxu1 %v1338_v35  ;;  %1919 = vmatpush3.msra.mxu0 %v1338_v35 }
 0x348   : > { %1914 = vmatmul.mubr.msk.f32.vlgmr.msra.gmra.mxu1 %vm668_vm0, %v1341_v36  ;;  %1921 = vmatmul.mubr.msk.f32.vlgmr.msra.gmra.mxu0 %vm668_vm0, %v1436_v37 }
 0x408   : > { %v1915_v41 = vpop.f32.mrf.mxu1  ;;  %v1922_v42 = vpop.f32.mrf.mxu0 }
 0x409   : > { %v1432_v44 = vadd.f32 %v1915_v41, %v1352_v40  ;;  %v1527_v45 = vadd.f32 %v1922_v42, %v1447_v39 }
 0x40a   : > { %v1426_v46 = vpop.f32.mrf.mxu1  ;;  %v1521_v47 = vpop.f32.mrf.mxu0 }
 0x40b   : > { %1533 = vst [vmem:[%s652_s3 + $0x8] sm:$0xff] %v1432_v44  ;;  %v1531_v48 = vadd.f32 %v1527_v45, %v2685_v5  ;;  %v1427_v49 = vadd.f32 %v1426_v46, %v1347_v43  ;;  %v1522_v50 = vadd.f32 %v1521_v47, %v1442_v38 }
 0x40d   : > { %1535 = vst [vmem:[%s2804_s14 + $0x8] sm:$0xff] %v1531_v48  ;;  %1532 = vst [vmem:[%s652_s3] sm:$0xff] %v1427_v49  ;;  %v1530_v51 = vadd.f32 %v1522_v50, %v2687_v6 }
 0x40e   : > { %2247 = shalt.err (!%p2244_p11)
}
 0x40f   : > { %s2248_s28 = scalar_lea.hbm %s2811_s25, 256  ;;  %s2252_s24 = scalar_lea.hbm %s2977_s15, 512 }
 0x410   : > { %p2249_p2 = scmp.ne.s32.totalorder %s2811_s25, %s2248_s28  ;;  %p2253_p0 = scmp.lt.s32.totalorder %s2811_s25, %s2977_s15 }
 0x411   : > { %p2254_p5 = scmp.lt.s32.totalorder %s2252_s24, %s2248_s28 }
 0x412   : > { %p2250_p12 = pnand %p2249_p2, %p2979_p3 }
 0x413   : > { %p2255_p1 = por %p2254_p5, %p2253_p0 }
 0x414   : > { %p2251_p13 = pneg %p2250_p12 }
 0x416   : > { %p2256_p7 = pnand %p2255_p1, %p2251_p13 }
 0x418   : > { %2259 = shalt.err (!%p2256_p7)
}
 0x419   : > { %s2355_s22 = smov 128   ;;  %s2356_s27 = smov 8   ;;  %1534 = vst [vmem:[%s2804_s14] sm:$0xff] %v1530_v51 }
 0x41a   : > { %1946 = dma.vmem_to_hbm [thread:$0]  (%p2979_p3), %s2801_s18, 256, %s2811_s25, %s1542_s10, %s2355_s22, %s2355_s22, %s2356_s27  }
 0x41b   : > { %s1537_s8 = scalar_lea.sflag [#allocation4], %s2659_s30  ;;  %s2260_s12 = scalar_lea.vmem %s2813_s20, 256 }
 0x41c   : > { %p2261_p6 = scmp.ne.s32.totalorder %s2813_s20, %s2260_s12  ;;  %s2357_s21 = smov [#allocation14]  }
 0x41d   : > { %s2264_s28 = sshll.u32 %s2357_s21, 4  ;;  %s2265_s28 = int_to_ptr.vmem [resolvable:$false] %s2264_s28 }
 0x41e   : > { %p2262_p9 = pnand %p2261_p6, %p2979_p3  ;;  %s2266_s3 = scalar_lea.vmem %s2265_s28, 512 }
 0x41f   : > { %p2267_p8 = scmp.lt.s32.totalorder %s2813_s20, %s2265_s28  ;;  %p2268_p10 = scmp.lt.s32.totalorder %s2266_s3, %s2260_s12 }
 0x420   : > { %p2263_p4 = pneg %p2262_p9 }
 0x421   : > { %p2269_p11 = por %p2268_p10, %p2267_p8 }
 0x423   : > { %p2270_p2 = pnand %p2269_p11, %p2263_p4 }
 0x425   : > { %2273 = shalt.err (!%p2270_p2)
}
 0x426   : > { %s2274_s18 = scalar_lea.hbm %s2820_s29, 256  ;;  %s2278_s25 = scalar_lea.hbm %s2978_s11, 512 }
 0x427   : > { %p2275_p12 = scmp.ne.s32.totalorder %s2820_s29, %s2274_s18  ;;  %p2279_p5 = scmp.lt.s32.totalorder %s2820_s29, %s2978_s11 }
 0x428   : > { %p2280_p1 = scmp.lt.s32.totalorder %s2278_s25, %s2274_s18 }
 0x429   : > { %p2276_p13 = pnand %p2275_p12, %p2979_p3 }
 0x42a   : > { %p2281_p7 = por %p2280_p1, %p2279_p5 }
 0x42b   : > { %p2277_p0 = pneg %p2276_p13 }
 0x42d   : > { %p2282_p6 = pnand %p2281_p7, %p2277_p0 }
 0x42f   : > { %2285 = shalt.err (!%p2282_p6)
}
 0x430   : > { %1945 = dma.vmem_to_hbm [thread:$0]  (%p2979_p3), %s2813_s20, 256, %s2820_s29, %s1537_s8, %s2355_s22, %s2355_s22, %s2356_s27  }
 0x431 PF: > { %s2980_s24 = sld [smem:[#allocation23_spill]] }
 0x432   : > { %s2981_s4 = sld [smem:[#allocation29_spill]] }
 0x433   : > { %s2982_s1 = sld [smem:[#allocation25_spill]] }
 0x437   : > { %s1586_s12 = sand.u32 1, %s2980_s24  }
 0x438   : > { %p2983_p9 = scmp.ne.s32.totalorder %s2981_s4, 0  ;;  %s1587_s21 = scalar_lea.sflag [#allocation4], %s1586_s12 }
 0x439   : > { %p2984_p4 = scmp.ge.s32.totalorder %s2982_s1, 2 }
 0x43b   : > { %p1973_p8 = pnand %p2984_p4, %p2983_p9 }
 0x43d   : > { %p1974_p10 = pneg %p1973_p8 }
 0x43f   : > { %2319 = dma.done.wait (%p1974_p10), %s1587_s21, 256  }
 0x440   : > { %2321 = vsyncadd (%p1974_p10), %s1587_s21, 4294967040  ;;  %s1596_s28 = scalar_lea.sflag [#allocation16], %s1586_s12 }
 0x441   : > { %2323 = dma.done.wait (%p1974_p10), %s1596_s28, 256  }
 0x442   : > { %2325 = vsyncadd (%p1974_p10), %s1596_s28, 4294967040  ;;  %s2985_s21 = sld [smem:[#allocation26_spill]]  ;;  %s2988_s18 = smov %s2332_s19 }
 0x443   : > { %s2986_s17 = sld [smem:[#allocation24_spill]] }
 0x444   : > { %s2987_s20 = sld [smem:[#allocation27_spill]] }
 0x448   : > { %p37_p3 = scmp.ge.s32.totalorder %s2985_s21, 4  }
 0x449   : > { %s2989_s19 = smov %s2986_s17 }
 0x44a   :  { %39 = sbr.rel (!%p37_p3) target bundleno = 22 (0x16), region = 182 }
 0x44f   :  { %1601 = vsyncpa [#allocation3], 1 }
 0x450   :  { %1603 = vsyncpa [#allocation3 + $0x1], 1 }
 0x451   :  { %1604 = vsyncpa [#allocation6], 1 }
 0x452   :  { %1606 = vsyncpa [#allocation6 + $0x1], 1 }
 0x453   :  { %1607 = vsyncpa [#allocation9], 1 }
 0x454   :  { %1608 = vsyncpa [#allocation12], 1 }
 0x455   :  { %1609 = vsyncpa [#allocation4], 1 }
 0x456   :  { %1611 = vsyncpa [#allocation4 + $0x1], 1 }
 0x457   :  { %1612 = vsyncpa [#allocation16], 1 }
 0x458   :  { %1614 = vsyncpa [#allocation16 + $0x1], 1 }

</bundles_post_ra>
